<compile_context>
chip_gen: v5e
topology: v5e:2x2
jax: 0.10.0
libtpu: 0.0.40
codegen_flags: <defaults>
</compile_context>

<pallas_src>
FLOW_REG_BY_MAX = True     # cfg.FLOW_REG_BY_MAX
TRUNCATED = False          # cfg.TRUNCATED
TRUNCATED_SIZE = 4         # cfg.TRUNCATED_SIZE (only used if TRUNCATED)

import functools

import jax
import jax.numpy as jnp
from jax import lax
from jax.experimental import pallas as pl
from jax.experimental.pallas import tpu as pltpu


def _round_up(x, m):
    return ((x + m - 1) // m) * m


# ----------------------------- fused Pallas kernel -----------------------------
def _flow_reg_kernel(*refs, flow_reg_by_max, truncated, truncated_size, size_v):
    """Refs:
       x_ref : (1, D, TP) cost-volume tile, native dtype (D = sizeU*sizeV, TP = pixel tile)
       w_ref : (8, D) f32 reduction weights, rows = [ones ; dispU ; dispV ; 0-pad]
       cu_ref/cv_ref (only if truncated): (D, 1) int32 candidate u / v indices
       o_ref : (1, 2, TP) f32 flow tile."""
    if truncated:
        x_ref, w_ref, cu_ref, cv_ref, o_ref = refs
    else:
        x_ref, w_ref, o_ref = refs

    v = x_ref[0].astype(jnp.float32)                            # (D, TP) upcast in VMEM

    if truncated:
        # Keep-window around the per-pixel argmax of the RAW scores (matches torch argmax).
        # Heavy div/mod only on the (1, TP) argmax vector; candidate (u, v) are resident (D, 1).
        d, tp = v.shape
        d_iota = lax.broadcasted_iota(jnp.int32, (d, tp), 0)
        vmax = jnp.max(v, axis=0, keepdims=True)
        idx = jnp.min(jnp.where(v == vmax, d_iota, d), axis=0, keepdims=True)  # (1, TP)
        iu = idx // size_v                                       # (1, TP)
        iv = idx - iu * size_v                                    # (1, TP)
        keep = ((jnp.abs(cu_ref[...] - iu) <= truncated_size) &
                (jnp.abs(cv_ref[...] - iv) <= truncated_size))    # (D, TP)

    if not flow_reg_by_max:
        v = -v                                                    # softmin(x) == softmax(-x)
    if truncated:
        # TODO(synk): PyTorch masks raw x with -inf *before* softmin (degenerate for the
        # truncated+softmin combo); we mask after the negation so it stays well defined.
        v = jnp.where(keep, v, jnp.float32(-jnp.inf))

    # Numerically-stable softmax over candidates (sublanes), with all three candidate-axis
    # reductions fused into one tiny MXU matmul; normalize once on (1, TP) vectors.
    mx = jnp.max(v, axis=0, keepdims=True)                        # (1, TP)   XLU
    e = jnp.exp(v - mx)                                           # (D, TP)   EUP
    r = jnp.dot(w_ref[...], e, preferred_element_type=jnp.float32,
                precision=lax.Precision.HIGHEST)                  # (8, TP): [s, num_u, num_v, ..]
    inv = 1.0 / r[0:1, :]                                         # exact divide, tiny (1, TP)
    o_ref[0] = r[1:3, :] * inv                                    # (2, TP) lane-dense store


# ----------------------------- wrapper ------------------------------------------
def flow_regression(x, max_u, max_v, ratio=None, *,
                    flow_reg_by_max=FLOW_REG_BY_MAX,
                    truncated=TRUNCATED,
                    truncated_size=TRUNCATED_SIZE,
                    tile_pixels=8192):
    """x: (B, 1, 2*maxU+1, 2*maxV'+1, H, W) -> flow (B, 2, H, W), like the PyTorch module.
    (maxV' = int(maxV // ratio) when ratio is given.)"""
    if ratio is not None:
        max_v = int(max_v // ratio)
    size_u = 2 * max_u + 1
    size_v = 2 * max_v + 1

    b = x.shape[0]
    assert x.shape[1] == 1 and x.shape[2] == size_u and x.shape[3] == size_v
    h, w = x.shape[4], x.shape[5]
    d = size_u * size_v
    m = h * w

    # squeeze(1) + flatten (U,V)->D and (H,W)->pixels: pure reshape (contiguous), no transpose,
    # no dtype cast -- the cost volume is read from HBM exactly once, in its native dtype.
    xf = x.reshape(b, d, m)
    in_bytes = jnp.dtype(xf.dtype).itemsize

    # Lane-dense pixel tile: as large as a modest VMEM budget allows (amortizes the ~0.35us
    # per-grid-step overhead), multiple of 128.  Ragged tail handled by Pallas block masking.
    tp = min(int(tile_pixels), _round_up(m, 128))
    budget = 12 * 1024 * 1024                       # x double-buffer + f32 temps per block
    per_pixel = d * (2 * in_bytes + 8)
    tp = min(tp, max(128, (budget // per_pixel) // 128 * 128))
    if tp >= m:
        tp = m                                      # single full-width block (full dims legal)
    n_tiles = pl.cdiv(m, tp)

    # (8, D) reduction weights for the MXU: rows = [ones ; dispU ; dispV ; zeros].
    cand = jnp.arange(d, dtype=jnp.int32)
    cand_u = cand // size_v
    cand_v = cand % size_v
    wts = jnp.zeros((8, d), jnp.float32)
    wts = wts.at[0].set(1.0)
    wts = wts.at[1].set((cand_u - max_u).astype(jnp.float32))
    wts = wts.at[2].set((cand_v - max_v).astype(jnp.float32))

    kernel = functools.partial(
        _flow_reg_kernel,
        flow_reg_by_max=bool(flow_reg_by_max),
        truncated=bool(truncated),
        truncated_size=int(truncated_size),
        size_v=int(size_v),
    )

    in_specs = [
        pl.BlockSpec((1, d, tp), lambda j, i: (i, 0, j)),   # cost-volume tile (lane-dense)
        pl.BlockSpec((8, d), lambda j, i: (0, 0)),          # reduction weights (resident)
    ]
    args = [xf, wts]
    if truncated:
        in_specs += [pl.BlockSpec((d, 1), lambda j, i: (0, 0)),
                     pl.BlockSpec((d, 1), lambda j, i: (0, 0))]
        args += [cand_u.reshape(d, 1), cand_v.reshape(d, 1)]

    out = pl.pallas_call(
        kernel,
        out_shape=jax.ShapeDtypeStruct((b, 2, m), jnp.float32),
        grid=(n_tiles, b),                                  # large pixel axis leads (megacore)
        in_specs=in_specs,
        out_specs=pl.BlockSpec((1, 2, tp), lambda j, i: (i, 0, j)),
        compiler_params=pltpu.CompilerParams(
            dimension_semantics=("parallel", "parallel"),
            vmem_limit_bytes=32 * 1024 * 1024),
    )(*args)

    return out.reshape(b, 2, h, w)


flow_regression_jit = jax.jit(
    flow_regression,
    static_argnames=("max_u", "max_v", "ratio", "flow_reg_by_max",
                     "truncated", "truncated_size", "tile_pixels"),
)


# ----------------------------- pure-JAX reference --------------------------------
def flow_regression_ref(x, max_u, max_v, ratio=None):
    if ratio is not None:
        max_v = int(max_v // ratio)
    size_u = 2 * max_u + 1
    size_v = 2 * max_v + 1
    b, _, _, _, h, w = x.shape
    xs = x.reshape(b, size_u * size_v, h, w).astype(jnp.float32)
    p = jax.nn.softmax(xs if FLOW_REG_BY_MAX else -xs, axis=1)
    cand = jnp.arange(size_u * size_v)
    du = (cand // size_v - max_u).astype(jnp.float32).reshape(1, -1, 1, 1)
    dv = (cand % size_v - max_v).astype(jnp.float32).reshape(1, -1, 1, 1)
    fu = jnp.sum(p * du, axis=1)
    fv = jnp.sum(p * dv, axis=1)
    return jnp.stack([fu, fv], axis=1)


# ----------------------------- main ----------------------------------------------
if __name__ == "__main__":
    key = jax.random.PRNGKey(0)
    max_u, max_v = 3, 3                       # sizeU = sizeV = 7, D = 49
    B, H, W = 2, 16, 16
    x = jax.random.normal(
        key, (B, 1, 2 * max_u + 1, 2 * max_v + 1, H, W), jnp.float32) * 4.0

    out = flow_regression_jit(x, max_u=max_u, max_v=max_v)
    out = jax.block_until_ready(out)
    assert out.shape == (B, 2, H, W)
    ref = flow_regression_ref(x, max_u, max_v)
    err = float(jnp.max(jnp.abs(out - ref)))
    assert err < 1e-4, f"max abs error vs reference: {err}"

    # Ragged pixel-tile path (H*W not a multiple of the 128-lane tile): no wrapper-side pad,
    # Pallas masks the partial last block.
    H2, W2 = 16, 20                                            # m = 320, tp = 128 -> 3 blocks
    x2 = jax.random.normal(
        jax.random.PRNGKey(1), (B, 1, 7, 7, H2, W2), jnp.float32) * 4.0
    out2 = jax.block_until_ready(
        flow_regression_jit(x2, max_u=max_u, max_v=max_v, tile_pixels=128))
    assert out2.shape == (B, 2, H2, W2)
    ref2 = flow_regression_ref(x2, max_u, max_v)
    err2 = float(jnp.max(jnp.abs(out2 - ref2)))
    assert err2 < 1e-4, f"max abs error vs reference (ragged): {err2}"

    print("KERNEL_OK")
</pallas_src>

<mosaic_0001>
module attributes {stable_mosaic.version = 11 : i64} {
  func.func @_flow_reg_kernel(%arg0: i32, %arg1: i32, %arg2: memref<1x49x256xf32, #tpu.memory_space<vmem>>, %arg3: memref<8x49xf32, #tpu.memory_space<vmem>>, %arg4: memref<1x2x256xf32, #tpu.memory_space<vmem>>) attributes {dimension_semantics = [#tpu.dimension_semantics<parallel>, #tpu.dimension_semantics<parallel>], iteration_bounds = array<i64: 1, 2>, scalar_prefetch = 0 : i64, scratch_operands = 0 : i64, tpu.core_type = #tpu.core_type<tc>, window_params = [{transform_indices = @transform_0, window_bounds = array<i64: 1, 49, 256>}, {pipeline_mode = #tpu.pipeline_mode<synchronous>, transform_indices = @transform_1, window_bounds = array<i64: 8, 49>}, {transform_indices = @transform_2, window_bounds = array<i64: 1, 2, 256>}]} {
    %c0 = arith.constant 0 : index
    %c0_0 = arith.constant 0 : index
    %c0_1 = arith.constant 0 : index
    %0 = vector.load %arg2[%c0, %c0_0, %c0_1] : memref<1x49x256xf32, #tpu.memory_space<vmem>>, vector<1x49x256xf32>
    %1 = vector.shape_cast %0 : vector<1x49x256xf32> to vector<49x256xf32>
    %cst = arith.constant dense<0xFF800000> : vector<256xf32>
    %2 = vector.multi_reduction <maximumf>, %1, %cst [0] : vector<49x256xf32> to vector<256xf32>
    %3 = vector.shape_cast %2 : vector<256xf32> to vector<1x256xf32>
    %4 = vector.broadcast %3 : vector<1x256xf32> to vector<49x256xf32>
    %5 = arith.subf %1, %4 : vector<49x256xf32>
    %6 = math.exp %5 : vector<49x256xf32>
    %c0_2 = arith.constant 0 : index
    %c0_3 = arith.constant 0 : index
    %7 = vector.load %arg3[%c0_2, %c0_3] : memref<8x49xf32, #tpu.memory_space<vmem>>, vector<8x49xf32>
    %cst_4 = arith.constant dense<0.000000e+00> : vector<8x256xf32>
    %8 = tpu.matmul %7, %6, %cst_4 {dimension_numbers = #tpu.dot_dimension_numbers<[1], [0], [0], [1], [0, 0, 1, 1], [], []>, precision = #tpu.contract_precision<fp32>} : vector<8x49xf32>, vector<49x256xf32>, vector<8x256xf32> -> vector<8x256xf32>
    %9 = vector.extract_strided_slice %8 {offsets = [0, 0], sizes = [1, 256], strides = [1, 1]} : vector<8x256xf32> to vector<1x256xf32>
    %cst_5 = arith.constant 1.000000e+00 : f32
    %10 = vector.broadcast %cst_5 : f32 to vector<1x256xf32>
    %11 = arith.divf %10, %9 : vector<1x256xf32>
    %12 = vector.extract_strided_slice %8 {offsets = [1, 0], sizes = [2, 256], strides = [1, 1]} : vector<8x256xf32> to vector<2x256xf32>
    %13 = vector.broadcast %11 : vector<1x256xf32> to vector<2x256xf32>
    %14 = arith.mulf %12, %13 : vector<2x256xf32>
    %c0_6 = arith.constant 0 : index
    %c0_7 = arith.constant 0 : index
    %c0_8 = arith.constant 0 : index
    %15 = vector.load %arg4[%c0_6, %c0_7, %c0_8] : memref<1x2x256xf32, #tpu.memory_space<vmem>>, vector<1x2x256xf32>
    %16 = vector.shape_cast %15 : vector<1x2x256xf32> to vector<2x256xf32>
    %17 = vector.shape_cast %14 : vector<2x256xf32> to vector<1x2x256xf32>
    tpu.vector_store %arg4[%c0_6, %c0_7, %c0_8], %17 {strides = array<i32>} : memref<1x2x256xf32, #tpu.memory_space<vmem>>, vector<1x2x256xf32>,
    return
  }
  func.func @transform_0(%arg0: i32, %arg1: i32) -> (i32, i32, i32) {
    %c0_i32 = arith.constant 0 : i32
    %c0_i32_0 = arith.constant 0 : i32
    return %arg1, %c0_i32, %arg0 : i32, i32, i32
  }
  func.func @transform_1(%arg0: i32, %arg1: i32) -> (i32, i32) {
    %c0_i32 = arith.constant 0 : i32
    %c0_i32_0 = arith.constant 0 : i32
    %c0_i32_1 = arith.constant 0 : i32
    return %c0_i32, %c0_i32_0 : i32, i32
  }
  func.func @transform_2(%arg0: i32, %arg1: i32) -> (i32, i32, i32) {
    %c0_i32 = arith.constant 0 : i32
    %c0_i32_0 = arith.constant 0 : i32
    return %arg1, %c0_i32, %arg0 : i32, i32, i32
  }
}

</mosaic_0001>

<bundles_post_ra>
// kernel: flow_regression.1
= control target key start
LH: loop header
LB: loop body
LE: loop exit
PB: predicated region body
PF: predicated region fallthrough
CT: control target
= control target key end

     0   :  { %s975_s9 = smov 0   ;;  %s977_s10 = smov 0   ;;  %s1258_s0 = inlined_call_operand.vmem [shape: f32[2,49,256], index: 0, kind: input, shape index: {}]   ;;  %s1259_s1 = inlined_call_operand.vmem [shape: f32[8,49], index: 1, kind: input, shape index: {}]   ;;  %s1260_s2 = inlined_call_operand.vmem [shape: f32[2,2,256], index: 2, kind: output, shape index: {}]  }
   0x1   :  { %s979_s11 = smov 0  }
   0x2 LB: > { %s21_s12 = sadd.s32 1, %s954_s10  ;;  %p870_p0 = scmp.ge.s32.totalorder %s958_s11, 1  ;;  %s958_s11 = sphi %s979_s11, %s12_s11   ;;  %s954_s10 = sphi %s977_s10, %s1262_s10   ;;  %s950_s9 = sphi %s975_s9, %s1261_s9  }
   0x3   : > { %p22_p1 = scmp.ge.s32.totalorder %s21_s12, 2  ;;  %p133_p2 = scmp.lt.s32.totalorder %s958_s11, 3 }
   0x5   : > { %s1264_s12 = smov (%p22_p1, %s21_s12), 0  ;;  %p134_p3 = pnand %p870_p0, %p133_p2 }
   0x6   : > { %p164_p4 = scmp.lt.s32.totalorder (!%p134_p3), %s950_s9, 1 }
   0x7   : > { %137 = sbr.rel (%p134_p3) target bundleno = 263 (0x107), region = 28 }
   0xc   : > { %s1266_s9 = smov (!%p164_p4, %s950_s9), 1  ;;  %vm201_vm0 = vcmask 1040384   ;;  %v266_v52 = vld [vmem:[%s1259_s1] sm:$0xff]  ;;  %vm267_vm1 = vcmask 400384   ;;  %vm767_vm8 = vcmask 1042434   ;;  %vm769_vm12 = vcmask 1044484  }
   0xd   : > { %s879_s13 = smul.u32 112, %s1266_s9  ;;  %v269_v58 = vsel %vm267_vm1, %v266_v52, 0  ;;  %vm768_vm11 = vmor %vm201_vm0, %vm767_vm8  ;;  %vm771_vm14 = vcmask 1046534   ;;  %vm762_vm15 = vcmask 1041408   ;;  %vm764_vm1 = vcmask 1043458   ;;  %s878_s19 = sshll.u32 %s1266_s9, 2 }
   0xe   : > { %vm770_vm13 = vmor %vm768_vm11, %vm769_vm12  ;;  %s181_s22 = scalar_lea.vmem %s1260_s2, %s878_s19 }
   0xf   : > { %s171_s16 = scalar_lea.vmem %s1258_s0, %s879_s13 }
  0x10   : > { %v183_v0 = vld [vmem:[%s171_s16] sm:$0xff]  ;;  %v185_v1 = vld [vmem:[%s171_s16 + $0x10] sm:$0xff]  ;;  %v999_v9 = vld [vmem:[%s171_s16 + $0x8] sm:$0xff] }
  0x11   : > { %v187_v2 = vld [vmem:[%s171_s16 + $0x20] sm:$0xff]  ;;  %v189_v3 = vld [vmem:[%s171_s16 + $0x30] sm:$0xff]  ;;  %v1001_v10 = vld [vmem:[%s171_s16 + $0x18] sm:$0xff] }
  0x12   : > { %v191_v4 = vld [vmem:[%s171_s16 + $0x40] sm:$0xff]  ;;  %v193_v5 = vld [vmem:[%s171_s16 + $0x50] sm:$0xff]  ;;  %v197_v6 = vmax.f32 %v183_v0, %v187_v2  ;;  %v198_v8 = vmax.f32 %v185_v1, %v189_v3  ;;  %v1004_v13 = vld [vmem:[%s171_s16 + $0x28] sm:$0xff] }
  0x13   : > { %v195_v7 = vld [vmem:[%s171_s16 + $0x60] sm:$0x1]  ;;  %v190_v14 = vld [vmem:[%s171_s16 + $0x38] sm:$0xff]  ;;  %v192_v15 = vld [vmem:[%s171_s16 + $0x48] sm:$0xff]  ;;  %v211_v19 = vmax.f32 %v999_v9, %v1004_v13 }
  0x14   : > { %v199_v11 = vmax.f32 %v197_v6, %v191_v4  ;;  %v202_v12 = vsel %vm201_vm0, %v195_v7, -inf  ;;  %v200_v16 = vmax.f32 %v198_v8, %v193_v5  ;;  %v194_v17 = vld [vmem:[%s171_s16 + $0x58] sm:$0xff]  ;;  %v196_v18 = vld [vmem:[%s171_s16 + $0x68] sm:$0x1]  ;;  %v212_v20 = vmax.f32 %v1001_v10, %v190_v14 }
  0x15   : > { %v215_v22 = vsel %vm201_vm0, %v196_v18, -inf  ;;  %v213_v23 = vmax.f32 %v211_v19, %v192_v15 }
  0x16   : > { %v203_v21 = vmax.f32 %v199_v11, %v202_v12  ;;  %v214_v24 = vmax.f32 %v212_v20, %v194_v17 }
  0x17   : > { %v216_v26 = vmax.f32 %v213_v23, %v215_v22 }
  0x18   : > { %v204_v25 = vmax.f32 %v203_v21, %v200_v16 }
  0x19   : > { %v217_v28 = vmax.f32 %v216_v26, %v214_v24 }
  0x1a   : > { %v205_v27 = vrot.slane %v204_v25, 4 }
  0x1b   : > { %v218_v30 = vrot.slane %v217_v28, 4 }
  0x1c   : > { %v206_v29 = vmax.f32 %v204_v25, %v205_v27 }
  0x1d   : > { %v219_v32 = vmax.f32 %v217_v28, %v218_v30 }
  0x1e   : > { %v207_v31 = vrot.slane %v206_v29, 2 }
  0x1f   : > { %v220_v34 = vrot.slane %v219_v32, 2 }
  0x20   : > { %v208_v33 = vmax.f32 %v206_v29, %v207_v31 }
  0x21   : > { %v221_v36 = vmax.f32 %v219_v32, %v220_v34 }
  0x22   : > { %v209_v35 = vrot.slane %v208_v33, 1 }
  0x23   : > { %v222_v38 = vrot.slane %v221_v36, 1 }
  0x24   : > { %v210_v37 = vmax.f32 %v208_v33, %v209_v35 }
  0x25   : > { %v1010_v45 = vmax.f32 %v221_v36, %v222_v38 }
  0x26   : > { %v236_v39 = vsub.f32 %v195_v7, %v210_v37  ;;  %v234_v40 = vsub.f32 %v193_v5, %v210_v37  ;;  %v232_v41 = vsub.f32 %v191_v4, %v210_v37  ;;  %v230_v42 = vsub.f32 %v189_v3, %v210_v37 }
  0x27   : > { %v228_v43 = vsub.f32 %v187_v2, %v210_v37  ;;  %v226_v44 = vsub.f32 %v185_v1, %v210_v37  ;;  %v224_v49 = vsub.f32 %v183_v0, %v210_v37  ;;  %v237_v51 = vsub.f32 %v196_v18, %v1010_v45 }
  0x28   : > { %v262_v46 = vmul.f32 1.442695, %v236_v39  ;;  %v258_v47 = vmul.f32 1.442695, %v234_v40  ;;  %v254_v48 = vmul.f32 1.442695, %v232_v41  ;;  %v235_v54 = vsub.f32 %v194_v17, %v1010_v45 }
  0x29   : > { %v250_v50 = vmul.f32 1.442695, %v230_v42  ;;  %v246_v53 = vmul.f32 1.442695, %v228_v43  ;;  %v242_v55 = vmul.f32 1.442695, %v226_v44  ;;  %v233_v56 = vsub.f32 %v192_v15, %v1010_v45 }
  0x2a   : > { %904 = vpow2.f32 %v262_v46  ;;  %v238_v57 = vmul.f32 1.442695, %v224_v49  ;;  %v231_v59 = vsub.f32 %v190_v14, %v1010_v45  ;;  %v264_v60 = vmul.f32 1.442695, %v237_v51 }
  0x2b   : > { %906 = vpow2.f32 %v258_v47  ;;  %v229_v61 = vsub.f32 %v1004_v13, %v1010_v45  ;;  %v260_v62 = vmul.f32 1.442695, %v235_v54  ;;  %v256_v63 = vmul.f32 1.442695, %v233_v56 }
  0x2c   : > { %908 = vpow2.f32 %v254_v48  ;;  %v1021_v0 = vand.u32 4294901760, %v269_v58  ;;  %v227_v1 = vsub.f32 %v1001_v10, %v1010_v45  ;;  %v252_v3 = vmul.f32 1.442695, %v231_v59 }
  0x2d   : > { %910 = vpow2.f32 %v250_v50  ;;  %v248_v6 = vmul.f32 1.442695, %v229_v61  ;;  %v225_v22 = vsub.f32 %v999_v9, %v1010_v45 }
  0x2e   : > { %912 = vpow2.f32 %v246_v53  ;;  %v1033_v10 = vsub.f32 %v269_v58, %v1021_v0  ;;  %v244_v14 = vmul.f32 1.442695, %v227_v1 }
  0x2f   : > { %914 = vpow2.f32 %v242_v55  ;;  %v240_v59 = vmul.f32 1.442695, %v225_v22 }
  0x30   : > { %v905_v2 = vpop.eup %904  ;;  %916 = vpow2.f32 %v238_v57  ;;  %v1104_v50 = vand.u32 4294901760, %v1033_v10 }
  0x31   : > { %v907_v4 = vpop.eup %906  ;;  %v272_v5 = vsel %vm201_vm0, %v905_v2, 0  ;;  %918 = vpow2.f32 %v264_v60 }
  0x32   : > { %v909_v7 = vpop.eup %908  ;;  %v1026_v8 = vand.u32 4294901760, %v272_v5  ;;  %v1028_v11 = vand.u32 4294901760, %v907_v4  ;;  %920 = vpow2.f32 %v260_v62 }
  0x33   : > { %v911_v12 = vpop.eup %910  ;;  %v1030_v13 = vand.u32 4294901760, %v909_v7  ;;  %922 = vpow2.f32 %v256_v63 }
  0x34   : > { %v913_v15 = vpop.eup %912  ;;  %287 = vmatpush.msra.mxu0 %v1026_v8  ;;  %v1037_v16 = vsub.f32 %v272_v5, %v1026_v8  ;;  %v1040_v17 = vsub.f32 %v907_v4, %v1028_v11  ;;  %411 = vmatpush.msra.mxu3 %v1026_v8  ;;  %v1043_v18 = vand.u32 4294901760, %v911_v12  ;;  %924 = vpow2.f32 %v252_v3 }
  0x35   : > { %v915_v19 = vpop.eup %914  ;;  %v1046_v20 = vsub.f32 %v909_v7, %v1030_v13  ;;  %v1048_v21 = vand.u32 4294901760, %v913_v15  ;;  %926 = vpow2.f32 %v248_v6 }
  0x36   : > { %v917_v23 = vpop.eup %916  ;;  %376 = vmatpush.msra.mxu2 %v1037_v16  ;;  %289 = vmatpush.msra.mxu0 %v1028_v11  ;;  %v320_v24 = vand.u32 4294901760, %v1037_v16  ;;  %v326_v25 = vand.u32 4294901760, %v1040_v17  ;;  %v1057_v26 = vsub.f32 %v911_v12, %v1043_v18  ;;  %v1059_v27 = vand.u32 4294901760, %v915_v19 }
  0x37   : > { %v919_v28 = vpop.eup %918  ;;  %413 = vmatpush.msra.mxu3 %v1028_v11  ;;  %v332_v29 = vand.u32 4294901760, %v1046_v20  ;;  %v1064_v9 = vsub.f32 %v913_v15, %v1048_v21  ;;  %v1066_v30 = vand.u32 4294901760, %v917_v23  ;;  %928 = vpow2.f32 %v244_v14 }
  0x38   : > { %v921_v31 = vpop.eup %920  ;;  %379 = vmatpush.msra.mxu2 %v1040_v17  ;;  %291 = vmatpush.msra.mxu0 %v1030_v13  ;;  %v321_v32 = vsub.f32 %v1037_v16, %v320_v24  ;;  %v327_v33 = vsub.f32 %v1040_v17, %v326_v25  ;;  %v338_v34 = vand.u32 4294901760, %v1057_v26  ;;  %v1078_v35 = vsub.f32 %v915_v19, %v1059_v27 }
  0x39   : > { %v923_v36 = vpop.eup %922  ;;  %415 = vmatpush.msra.mxu3 %v1030_v13  ;;  %v333_v37 = vsub.f32 %v1046_v20, %v332_v29  ;;  %v344_v38 = vand.u32 4294901760, %v1064_v9  ;;  %v1086_v39 = vsub.f32 %v917_v23, %v1066_v30  ;;  %v275_v40 = vsel %vm201_vm0, %v919_v28, 0 }
  0x3a   : > { %v925_v41 = vpop.eup %924  ;;  %v322_v42 = vand.u32 4294901760, %v321_v32  ;;  %382 = vmatpush.msra.mxu2 %v1046_v20  ;;  %293 = vmatpush.msra.mxu0 %v1043_v18  ;;  %v328_v43 = vand.u32 4294901760, %v327_v33  ;;  %v339_v44 = vsub.f32 %v1057_v26, %v338_v34  ;;  %v1094_v45 = vand.u32 4294901760, %v275_v40 }
  0x3b   : > { %v927_v46 = vpop.eup %926  ;;  %417 = vmatpush.msra.mxu3 %v1043_v18  ;;  %v345_v47 = vsub.f32 %v1064_v9, %v344_v38  ;;  %v350_v48 = vand.u32 4294901760, %v1078_v35  ;;  %v1101_v49 = vand.u32 4294901760, %v921_v31  ;;  %v334_v51 = vand.u32 4294901760, %v333_v37 }
  0x3c   : > { %323 = vmatpush.msra.mxu1 %v322_v42  ;;  %385 = vmatpush.msra.mxu2 %v1057_v26  ;;  %v1108_v52 = vsub.f32 %v275_v40, %v1094_v45  ;;  %v356_v53 = vand.u32 4294901760, %v1086_v39  ;;  %v1111_v54 = vand.u32 4294901760, %v923_v36  ;;  %v1121_v58 = vand.u32 4294901760, %v925_v41 }
  0x3d   : > { %v929_v55 = vpop.eup %928  ;;  %295 = vmatpush.msra.mxu0 %v1048_v21  ;;  %419 = vmatpush.msra.mxu3 %v1048_v21  ;;  %v351_v56 = vsub.f32 %v1078_v35, %v350_v48  ;;  %v1119_v57 = vsub.f32 %v921_v31, %v1101_v49  ;;  %v340_v60 = vand.u32 4294901760, %v339_v44  ;;  %v1128_v63 = vand.u32 4294901760, %v927_v46 }
  0x3e   : > { %329 = vmatpush.msra.mxu1 %v328_v43  ;;  %388 = vmatpush.msra.mxu2 %v1064_v9  ;;  %v544_v61 = vand.u32 4294901760, %v1108_v52  ;;  %v1126_v62 = vsub.f32 %v923_v36, %v1111_v54  ;;  %v346_v1 = vand.u32 4294901760, %v345_v47  ;;  %v1134_v3 = vsub.f32 %v925_v41, %v1121_v58 }
  0x3f   : > { %297 = vmatpush.msra.mxu0 %v1059_v27  ;;  %421 = vmatpush.msra.mxu3 %v1059_v27  ;;  %v550_v2 = vand.u32 4294901760, %v1119_v57  ;;  %v1136_v4 = vand.u32 4294901760, %v929_v55  ;;  %v357_v6 = vsub.f32 %v1086_v39, %v356_v53  ;;  %v1147_v12 = vsub.f32 %v927_v46, %v1128_v63 }
  0x40   : > { %335 = vmatpush.msra.mxu1 %v334_v51  ;;  %391 = vmatpush.msra.mxu2 %v1078_v35  ;;  %v545_v5 = vsub.f32 %v1108_v52, %v544_v61  ;;  %v556_v7 = vand.u32 4294901760, %v1126_v62  ;;  %v352_v14 = vand.u32 4294901760, %v351_v56  ;;  %930 = vpow2.f32 %v240_v59 }
  0x41   : > { %299 = vmatpush.msra.mxu0 %v1066_v30  ;;  %423 = vmatpush.msra.mxu3 %v1066_v30  ;;  %v551_v15 = vsub.f32 %v1119_v57, %v550_v2  ;;  %v562_v23 = vand.u32 4294901760, %v1134_v3  ;;  %v1160_v28 = vsub.f32 %v929_v55, %v1136_v4  ;;  %v303_v32 = vsub.f32 %v1033_v10, %v1104_v50 }
  0x42   : > { %341 = vmatpush.msra.mxu1 %v340_v60  ;;  %394 = vmatpush.msra.mxu2 %v1086_v39  ;;  %v546_v19 = vand.u32 4294901760, %v545_v5  ;;  %v557_v22 = vsub.f32 %v1126_v62, %v556_v7  ;;  %v358_v33 = vand.u32 4294901760, %v357_v6  ;;  %v568_v36 = vand.u32 4294901760, %v1147_v12 }
  0x43   : > { %443 = vmatpush.msrb.mxu0 %v320_v24  ;;  %v552_v31 = vand.u32 4294901760, %v551_v15  ;;  %v563_v24 = vsub.f32 %v1134_v3, %v562_v23  ;;  %v574_v37 = vand.u32 4294901760, %v1160_v28  ;;  %v304_v41 = vand.u32 4294901760, %v303_v32  ;;  %397 = vmatmul.f32.vlgmr.msra.gmra.mxu2 %v1033_v10 }
  0x44   : > { %511 = vmatpush.msrb.mxu2 %v1094_v45  ;;  %347 = vmatpush.msra.mxu1 %v346_v1  ;;  %v558_v16 = vand.u32 4294901760, %v557_v22  ;;  %v569_v17 = vsub.f32 %v1147_v12, %v568_v36 }
  0x45   : > { %547 = vmatpush.msrb.mxu3 %v546_v19  ;;  %447 = vmatpush.msrb.mxu0 %v326_v25  ;;  %v564_v20 = vand.u32 4294901760, %v563_v24 }
  0x46   : > { %513 = vmatpush.msrb.mxu2 %v1101_v49  ;;  %353 = vmatpush.msra.mxu1 %v352_v14  ;;  %v931_v40 = vpop.eup %930 }
  0x47   : > { %553 = vmatpush.msrb.mxu3 %v552_v31  ;;  %451 = vmatpush.msrb.mxu0 %v332_v29  ;;  %v1182_v25 = vand.u32 4294901760, %v931_v40  ;;  %v575_v29 = vsub.f32 %v1160_v28, %v574_v37 }
  0x48   : > { %515 = vmatpush.msrb.mxu2 %v1111_v54  ;;  %359 = vmatpush.msra.mxu1 %v358_v33 }
  0x49   : > { %455 = vmatpush.msrb.mxu0 %v338_v34  ;;  %559 = vmatpush.msrb.mxu3 %v558_v16  ;;  %v579_v42 = vsub.f32 %v931_v40, %v1182_v25  ;;  %v576_v26 = vand.u32 4294901760, %v575_v29 }
  0x4a   : > { %483 = vmatpush.msrb.mxu1 %v1026_v8  ;;  %517 = vmatpush.msrb.mxu2 %v1121_v58  ;;  %v570_v8 = vand.u32 4294901760, %v569_v17 }
  0x4b   : > { %305 = vmatmul.f32.vlgmr.msra.gmra.mxu0 %v304_v41  ;;  %427 = vmatmul.f32.vlgmr.msra.gmra.mxu3 %v1104_v50  ;;  %v580_v43 = vand.u32 4294901760, %v579_v42 }
  0x4c   : > { %485 = vmatpush.msrb.mxu1 %v1028_v11  ;;  %459 = vmatpush.msrb.mxu0 %v344_v38 }
  0x4d   : > { %519 = vmatpush.msrb.mxu2 %v1128_v63  ;;  %565 = vmatpush.msrb.mxu3 %v564_v20  ;;  %v581_v34 = vsub.f32 %v579_v42, %v580_v43 }
  0x4e   : > { %487 = vmatpush.msrb.mxu1 %v1030_v13  ;;  %463 = vmatpush.msrb.mxu0 %v350_v48 }
  0x4f   : > { %361 = vmatmul.f32.vlgmr.msra.gmra.mxu1 %v1021_v0  ;;  %521 = vmatpush.msrb.mxu2 %v1136_v4  ;;  %v582_v11 = vand.u32 4294901760, %v581_v34 }
  0x50   : > { %489 = vmatpush.msrb.mxu1 %v1043_v18  ;;  %571 = vmatpush.msrb.mxu3 %v570_v8 }
  0x51   : > { %467 = vmatpush.msrb.mxu0 %v356_v53  ;;  %523 = vmatpush.msrb.mxu2 %v1182_v25 }
  0x52   : > { %491 = vmatpush.msrb.mxu1 %v1048_v21  ;;  %577 = vmatpush.msrb.mxu3 %v576_v26 }
  0x53   : > { %600 = vmatpush.msra.mxu0 %v1108_v52  ;;  %667 = vmatpush.msra.mxu2 %v544_v61 }
  0x54   : > { %493 = vmatpush.msrb.mxu1 %v1059_v27  ;;  %583 = vmatpush.msrb.mxu3 %v582_v11 }
  0x55   : > { %469 = vmatmul.f32.vlgmr.msrb.gmra.mxu0 %v1021_v0  ;;  %671 = vmatpush.msra.mxu2 %v550_v2 }
  0x56   : > { %603 = vmatpush.msra.mxu0 %v1119_v57  ;;  %707 = vmatpush.msra.mxu3 %v1094_v45 }
  0x57   : > { %495 = vmatpush.msrb.mxu1 %v1066_v30  ;;  %675 = vmatpush.msra.mxu2 %v556_v7 }
  0x58   : > { %497 = vmatmul.f32.vlgmr.msrb.gmra.mxu1 %v1021_v0  ;;  %606 = vmatpush.msra.mxu0 %v1126_v62 }
  0x59   : > { %635 = vmatpush.msra.mxu1 %v1094_v45  ;;  %709 = vmatpush.msra.mxu3 %v1101_v49 }
  0x5a   : > { %529 = vmatmul.f32.vlgmr.msrb.gmra.mxu2 %v304_v41  ;;  %585 = vmatmul.f32.vlgmr.msrb.gmra.mxu3 %v1021_v0 }
  0x5b   : > { %609 = vmatpush.msra.mxu0 %v1134_v3  ;;  %637 = vmatpush.msra.mxu1 %v1101_v49 }
  0x5c   : > { %679 = vmatpush.msra.mxu2 %v562_v23  ;;  %711 = vmatpush.msra.mxu3 %v1111_v54 }
  0x5d   : > { %612 = vmatpush.msra.mxu0 %v1147_v12  ;;  %639 = vmatpush.msra.mxu1 %v1111_v54 }
  0x5e   : > { %683 = vmatpush.msra.mxu2 %v568_v36  ;;  %713 = vmatpush.msra.mxu3 %v1121_v58 }
  0x5f   : > { %615 = vmatpush.msra.mxu0 %v1160_v28  ;;  %641 = vmatpush.msra.mxu1 %v1121_v58 }
  0x60   : > { %687 = vmatpush.msra.mxu2 %v574_v37  ;;  %715 = vmatpush.msra.mxu3 %v1128_v63 }
  0x61   : > { %618 = vmatpush.msra.mxu0 %v579_v42  ;;  %643 = vmatpush.msra.mxu1 %v1128_v63 }
  0x62   : > { %691 = vmatpush.msra.mxu2 %v580_v43  ;;  %717 = vmatpush.msra.mxu3 %v1136_v4 }
  0x63   : > { %621 = vmatmul.f32.vlgmr.msra.gmra.mxu0 %v1033_v10  ;;  %693 = vmatmul.f32.vlgmr.msra.gmra.mxu2 %v1021_v0 }
  0x64   : > { %645 = vmatpush.msra.mxu1 %v1136_v4  ;;  %719 = vmatpush.msra.mxu3 %v1182_v25 }
  0x65   : > { %721 = vmatmul.f32.vlgmr.msra.gmra.mxu3 %v1021_v0 }
  0x66   : > { %647 = vmatpush.msra.mxu1 %v1182_v25 }
  0x67   : > { %651 = vmatmul.f32.vlgmr.msra.gmra.mxu1 %v1104_v50 }
  0xc6   : > { %v398_v21 = vpop.f32.mrf.mxu2 }
  0xc8   : > { %v306_v13 = vpop.f32.mrf.mxu0 }
  0xcc   : > { %v362_v18 = vpop.f32.mrf.mxu1 }
  0xcd   : > { %v363_v27 = vadd.f32 %v362_v18, %v306_v13 }
  0xce   : > { %v428_v30 = vpop.f32.mrf.mxu3 }
  0xcf   : > { %v399_v9 = vadd.f32 %v398_v21, %v363_v27 }
  0xd1   : > { %v429_v35 = vadd.f32 %v428_v30, %v399_v9 }
  0xd2   : > { %v470_v10 = vpop.f32.mrf.mxu0 }
  0xd3   : > { %v471_v38 = vadd.f32 %v470_v10, %v429_v35 }
  0xd5   : > { %v498_v39 = vpop.f32.mrf.mxu1 }
  0xd6   : > { %v499_v44 = vadd.f32 %v498_v39, %v471_v38 }
  0xd8   : > { %932 = vrcp.f32 %v499_v44  ;;  %v736_v62 = vand.u32 2147483648, %v499_v44  ;;  %vm730_vm3 = vweird.f32 %v499_v44  ;;  %v734_v63 = vand.u32 2147483647, %v499_v44 }
  0xda   : > { %v737_v6 = vor.u32 1.1754944e-38, %v736_v62  ;;  %vm735_vm6 = vcmp.eq.f32.partialorder %v734_v63, 8.507059e+37 }
  0xdd   : > { %v530_v45 = vpop.f32.mrf.mxu2  ;;  %v586_v46 = vpop.f32.mrf.mxu3 }
  0xde   : > { %v587_v47 = vadd.f32 %v586_v46, %v530_v45  ;;  %v933_v48 = vpop.eup %932 }
  0xdf   : > { %v726_v52 = vmul.f32 %v933_v48, %v499_v44  ;;  %vm731_vm2 = vweird.f32 %v933_v48 }
  0xe0   : > { %v622_v0 = vpop.f32.mrf.mxu0  ;;  %vm732_vm4 = vmor %vm730_vm3, %vm731_vm2 }
  0xe1   : > { %v623_v49 = vadd.f32 %v622_v0, %v587_v47  ;;  %v727_v57 = vsub.f32 1.0, %v726_v52  ;;  %vm772_vm2 = vmor %vm770_vm13, %vm771_vm14 }
  0xe3   : > { %v728_v58 = vmul.f32 %v933_v48, %v727_v57 }
  0xe4   : > { %v652_v51 = vpop.f32.mrf.mxu1 }
  0xe5   : > { %v653_v50 = vadd.f32 %v652_v51, %v623_v49  ;;  %v729_v60 = vadd.f32 %v933_v48, %v728_v58 }
  0xe6   : > { %v694_v53 = vpop.f32.mrf.mxu2 }
  0xe7   : > { %v695_v54 = vadd.f32 %v694_v53, %v653_v50  ;;  %v733_v3 = vsel %vm732_vm4, %v933_v48, %v729_v60 }
  0xe8   : > { %v722_v55 = vpop.f32.mrf.mxu3  ;;  %v738_v12 = vsel %vm735_vm6, %v737_v6, %v733_v3 }
  0xe9   : > { %v723_v56 = vadd.f32 %v722_v55, %v695_v54  ;;  %v755_v22 = vperm.slane %v738_v12, 0 }
  0xeb   : > { %934 = vrcp.f32 %v723_v56  ;;  %v751_v2 = vand.u32 2147483648, %v723_v56  ;;  %v749_v5 = vand.u32 2147483647, %v723_v56  ;;  %vm745_vm7 = vweird.f32 %v723_v56 }
  0xec   : > { %v757_v31 = vmul.f32 %v755_v22, %v499_v44 }
  0xed   : > { %v752_v14 = vor.u32 1.1754944e-38, %v751_v2  ;;  %vm750_vm10 = vcmp.eq.f32.partialorder %v749_v5, 8.507059e+37 }
  0xf1   : > { %v935_v59 = vpop.eup %934 }
  0xf2   : > { %v741_v61 = vmul.f32 %v935_v59, %v723_v56  ;;  %vm746_vm5 = vweird.f32 %v935_v59 }
  0xf3   : > { %vm747_vm9 = vmor %vm745_vm7, %vm746_vm5 }
  0xf4   : > { %v742_v1 = vsub.f32 1.0, %v741_v61 }
  0xf6   : > { %v743_v4 = vmul.f32 %v935_v59, %v742_v1 }
  0xf8   : > { %v744_v7 = vadd.f32 %v935_v59, %v743_v4 }
  0xfa   : > { %v748_v15 = vsel %vm747_vm9, %v935_v59, %v744_v7 }
  0xfb   : > { %v753_v19 = vsel %vm750_vm10, %v752_v14, %v748_v15 }
  0xfc   : > { %v756_v23 = vperm.slane %v753_v19, 0 }
  0xfe   : > { %v758_v28 = vmul.f32 %v756_v23, %v723_v56 }
 0x100   : > { %v761_v32 = vrot.slane %v758_v28, 6 }
 0x102   : > { %v763_v33 = vsel %vm762_vm15, %v757_v31, %v761_v32  ;;  %v765_v36 = vsel %vm764_vm1, %v757_v31, %v761_v32 }
 0x103   : > { %v874_v16 = vrot.slane %v763_v33, 9  ;;  %v875_v24 = vrot.slane %v765_v36, 9 }
 0x105   : > { %v776_v37 = vsel %vm772_vm2, %v874_v16, %v875_v24 }
 0x106   : > { %778 = vst [vmem:[%s181_s22] sm:$0xf] %v776_v37 }
 0x107 PF: > { %s12_s11 = sadd.s32 1, %s958_s11   ;;  %s1261_s9 = smov %s954_s10 }
 0x108   : > { %p9_p5 = scmp.ge.s32.totalorder %s12_s11, 4   ;;  %s1262_s10 = smov %s1264_s12 }
 0x10a   :  { %11 = sbr.rel (!%p9_p5) target bundleno = 2 (0x2), region = 58 }

</bundles_post_ra>
